<compile_context>
chip_gen: v5e
topology: v5e:2x2
jax: 0.10.0
libtpu: 0.0.40
codegen_flags: <defaults>
</compile_context>

<pallas_src>
import functools

import jax
import jax.numpy as jnp
import numpy as np
from jax.experimental import pallas as pl
from jax.experimental.pallas import tpu as pltpu

VOCAB = 16384   # ee1 rows
NPOS = 48       # ee2 rows
D = 64          # embedding dim
XB = 8          # quantization bits
SCALE = float(2 ** (XB - 1))   # 128.0


def _lpre_kernel(x_ref, ee1_hbm, ee2_ref, mm_ref, out_ref, gbuf, sems, *,
                 sp1, L):
    b = pl.program_id(0)

    # Gather the L ee1 rows for this batch element: issue all row DMAs
    # concurrently (only the needed 256 B rows leave HBM), then wait.
    copies = []
    for i in range(L):
        cp = pltpu.make_async_copy(
            ee1_hbm.at[pl.ds(x_ref[b, i], 1), :],   # (1, D) row of ee1 in HBM
            gbuf.at[pl.ds(i, 1), :],                # (1, D) slot in VMEM
            sems.at[i])
        cp.start()
        copies.append(cp)
    for cp in copies:
        cp.wait()

    # e = ee1[x[b, :]] + ee2[sp1:sp1+L]   (ee2 table resident in VMEM)
    e = gbuf[...] + ee2_ref[pl.ds(sp1, L), :]       # (L, D) f32

    min_w = mm_ref[0]
    max_w = mm_ref[1]
    t = (e - min_w) / (max_w - min_w)               # exact divide (see notes)
    t = (t - 0.5) * 2.0
    # Exact collapse of: floor(t*128+0.5)/128 -> clip[-1, 1-1/128]
    #                    -> *128 +0.5 -> floor -> clip[-128, 127]
    q = jnp.clip(jnp.floor(t * SCALE + 0.5), -SCALE, SCALE - 1.0)

    out_ref[...] = q[None]                          # (1, L, D) block


def precompute_lpre_stats(ee1_w, ee2_w):
    """Weight statistics (torch's .data.min()/.max()) — compute once, reuse."""
    return jnp.stack([ee1_w.min() + ee2_w.min(),
                      ee1_w.max() + ee2_w.max()]).astype(jnp.float32)


@functools.partial(jax.jit, static_argnames=("sp1", "sp2"))
def lpre_forward(x_idx, ee1_w, ee2_w, minmax, *, sp1, sp2):
    """x_idx: (sb, L) int32 with L == sp2 - sp1. Returns (sb, D, L) float32."""
    sb, L = x_idx.shape
    assert L == sp2 - sp1

    kernel = functools.partial(_lpre_kernel, sp1=sp1, L=L)

    grid_spec = pltpu.PrefetchScalarGridSpec(
        num_scalar_prefetch=1,                 # x_idx lands in SMEM
        grid=(sb,),                            # one step per batch element
        in_specs=[
            # ee1 weight table stays in HBM; rows gathered by manual DMA.
            pl.BlockSpec(memory_space=pl.ANY),
            # ee2 table (12 KB) fully resident in VMEM, fetched once.
            pl.BlockSpec((NPOS, D), lambda b, xref: (0, 0)),
            # cached scalar [min_w, max_w] pair in SMEM.
            pl.BlockSpec(memory_space=pltpu.MemorySpace.SMEM),
        ],
        out_specs=pl.BlockSpec((1, L, D), lambda b, xref: (b, 0, 0)),
        scratch_shapes=[
            pltpu.VMEM((L, D), jnp.float32),        # gathered ee1 rows
            pltpu.SemaphoreType.DMA((L,)),          # one sem per row DMA
        ],
    )

    out = pl.pallas_call(
        kernel,
        out_shape=jax.ShapeDtypeStruct((sb, L, D), jnp.float32),
        grid_spec=grid_spec,
        compiler_params=pltpu.CompilerParams(
            dimension_semantics=("parallel",)),     # v7x megacore over batch
    )(x_idx, ee1_w, ee2_w, minmax)

    # (sb, L, D) -> permute(0, 2, 1) -> (sb, D, L)   (layout plumbing only)
    return jnp.transpose(out, (0, 2, 1))


def lpre_reference(x_idx, ee1_w, ee2_w, sp1, sp2):
    pp = jnp.arange(sp1, sp2)
    ed = ee1_w[x_idx] + ee2_w[pp][None, :, :]
    min_w = ee1_w.min() + ee2_w.min()
    max_w = ee1_w.max() + ee2_w.max()
    t = (ed - min_w) / (max_w - min_w)
    t = (t - 0.5) * 2.0
    t = jnp.floor(t * SCALE + 0.5) / SCALE
    t = jnp.clip(t, -1.0, 1.0 - 1.0 / SCALE)
    t = jnp.floor(t * SCALE + 0.5)
    t = jnp.clip(t, -SCALE, SCALE - 1.0)
    return jnp.transpose(t, (0, 2, 1))


if __name__ == "__main__":
    key = jax.random.PRNGKey(0)
    k1, k2, k3 = jax.random.split(key, 3)

    # Deterministic parameter init (nn.Embedding default: N(0, 1)).
    ee1_w = jax.random.normal(k1, (VOCAB, D), dtype=jnp.float32)
    ee2_w = jax.random.normal(k2, (NPOS, D), dtype=jnp.float32)

    sb, sp1, sp2 = 2, 5, 13          # seq length L = 8
    L = sp2 - sp1
    x_idx = jax.random.randint(k3, (sb, L), 0, VOCAB, dtype=jnp.int32)

    # Parameter statistics computed ONCE (not per forward call).
    minmax = precompute_lpre_stats(ee1_w, ee2_w)

    out = lpre_forward(x_idx, ee1_w, ee2_w, minmax, sp1=sp1, sp2=sp2)
    out = jax.block_until_ready(out)

    ref = lpre_reference(x_idx, ee1_w, ee2_w, sp1, sp2)
    np.testing.assert_allclose(np.asarray(out), np.asarray(ref), atol=1e-5)
    assert out.shape == (sb, D, L) and out.dtype == jnp.float32

    print("KERNEL_OK")
</pallas_src>

<mosaic_0001>
module attributes {stable_mosaic.version = 11 : i64} {
  func.func @_lpre_kernel(%arg0: i32, %arg1: memref<2x8xi32, #tpu.memory_space<smem>>, %arg2: memref<16384x64xf32, #tpu.memory_space<any>>, %arg3: memref<48x64xf32, #tpu.memory_space<vmem>>, %arg4: memref<2xf32, #tpu.memory_space<smem>>, %arg5: memref<1x8x64xf32, #tpu.memory_space<vmem>>, %arg6: memref<8x64xf32, #tpu.memory_space<vmem>>, %arg7: memref<8x!tpu.dma_semaphore, #tpu.memory_space<semaphore_mem>>) attributes {dimension_semantics = [#tpu.dimension_semantics<parallel>], iteration_bounds = array<i64: 2>, scalar_prefetch = 1 : i64, scratch_operands = 2 : i64, tpu.core_type = #tpu.core_type<tc>, window_params = [{}, {pipeline_mode = #tpu.pipeline_mode<synchronous>, transform_indices = @transform_1, window_bounds = array<i64: 48, 64>}, {transform_indices = @transform_2, window_bounds = array<i64: 2>}, {transform_indices = @transform_3, window_bounds = array<i64: 1, 8, 64>}]} {
    %0 = arith.index_cast %arg0 : i32 to index
    %c0 = arith.constant 0 : index
    %1 = memref.load %arg1[%0, %c0] : memref<2x8xi32, #tpu.memory_space<smem>>
    %c0_i32 = arith.constant 0 : i32
    %c0_i32_0 = arith.constant 0 : i32
    %2 = tpu.memref_slice %arg2[%1, %c0_i32_0] : memref<16384x64xf32, #tpu.memory_space<any>> -> memref<1x64xf32, #tpu.memory_space<any>>
    %c0_i32_1 = arith.constant 0 : i32
    %c0_i32_2 = arith.constant 0 : i32
    %3 = tpu.memref_slice %arg6[%c0_i32_1, %c0_i32_2] : memref<8x64xf32, #tpu.memory_space<vmem>> -> memref<1x64xf32, #tpu.memory_space<vmem>>
    %4 = tpu.memref_slice %arg7[%c0_i32] : memref<8x!tpu.dma_semaphore, #tpu.memory_space<semaphore_mem>> -> memref<1x!tpu.dma_semaphore, #tpu.memory_space<semaphore_mem>>
    %5 = tpu.memref_squeeze %4 : memref<1x!tpu.dma_semaphore, #tpu.memory_space<semaphore_mem>> -> memref<!tpu.dma_semaphore, #tpu.memory_space<semaphore_mem>>
    tpu.enqueue_dma source(%2 : memref<1x64xf32, #tpu.memory_space<any>>) target(%3 : memref<1x64xf32, #tpu.memory_space<vmem>>) target_semaphore(%5 : memref<!tpu.dma_semaphore, #tpu.memory_space<semaphore_mem>>)
    %6 = arith.index_cast %arg0 : i32 to index
    %c1 = arith.constant 1 : index
    %7 = memref.load %arg1[%6, %c1] : memref<2x8xi32, #tpu.memory_space<smem>>
    %c1_i32 = arith.constant 1 : i32
    %c0_i32_3 = arith.constant 0 : i32
    %8 = tpu.memref_slice %arg2[%7, %c0_i32_3] : memref<16384x64xf32, #tpu.memory_space<any>> -> memref<1x64xf32, #tpu.memory_space<any>>
    %c1_i32_4 = arith.constant 1 : i32
    %c0_i32_5 = arith.constant 0 : i32
    %9 = tpu.memref_slice %arg6[%c1_i32_4, %c0_i32_5] : memref<8x64xf32, #tpu.memory_space<vmem>> -> memref<1x64xf32, #tpu.memory_space<vmem>>
    %10 = tpu.memref_slice %arg7[%c1_i32] : memref<8x!tpu.dma_semaphore, #tpu.memory_space<semaphore_mem>> -> memref<1x!tpu.dma_semaphore, #tpu.memory_space<semaphore_mem>>
    %11 = tpu.memref_squeeze %10 : memref<1x!tpu.dma_semaphore, #tpu.memory_space<semaphore_mem>> -> memref<!tpu.dma_semaphore, #tpu.memory_space<semaphore_mem>>
    tpu.enqueue_dma source(%8 : memref<1x64xf32, #tpu.memory_space<any>>) target(%9 : memref<1x64xf32, #tpu.memory_space<vmem>>) target_semaphore(%11 : memref<!tpu.dma_semaphore, #tpu.memory_space<semaphore_mem>>)
    %12 = arith.index_cast %arg0 : i32 to index
    %c2 = arith.constant 2 : index
    %13 = memref.load %arg1[%12, %c2] : memref<2x8xi32, #tpu.memory_space<smem>>
    %c2_i32 = arith.constant 2 : i32
    %c0_i32_6 = arith.constant 0 : i32
    %14 = tpu.memref_slice %arg2[%13, %c0_i32_6] : memref<16384x64xf32, #tpu.memory_space<any>> -> memref<1x64xf32, #tpu.memory_space<any>>
    %c2_i32_7 = arith.constant 2 : i32
    %c0_i32_8 = arith.constant 0 : i32
    %15 = tpu.memref_slice %arg6[%c2_i32_7, %c0_i32_8] : memref<8x64xf32, #tpu.memory_space<vmem>> -> memref<1x64xf32, #tpu.memory_space<vmem>>
    %16 = tpu.memref_slice %arg7[%c2_i32] : memref<8x!tpu.dma_semaphore, #tpu.memory_space<semaphore_mem>> -> memref<1x!tpu.dma_semaphore, #tpu.memory_space<semaphore_mem>>
    %17 = tpu.memref_squeeze %16 : memref<1x!tpu.dma_semaphore, #tpu.memory_space<semaphore_mem>> -> memref<!tpu.dma_semaphore, #tpu.memory_space<semaphore_mem>>
    tpu.enqueue_dma source(%14 : memref<1x64xf32, #tpu.memory_space<any>>) target(%15 : memref<1x64xf32, #tpu.memory_space<vmem>>) target_semaphore(%17 : memref<!tpu.dma_semaphore, #tpu.memory_space<semaphore_mem>>)
    %18 = arith.index_cast %arg0 : i32 to index
    %c3 = arith.constant 3 : index
    %19 = memref.load %arg1[%18, %c3] : memref<2x8xi32, #tpu.memory_space<smem>>
    %c3_i32 = arith.constant 3 : i32
    %c0_i32_9 = arith.constant 0 : i32
    %20 = tpu.memref_slice %arg2[%19, %c0_i32_9] : memref<16384x64xf32, #tpu.memory_space<any>> -> memref<1x64xf32, #tpu.memory_space<any>>
    %c3_i32_10 = arith.constant 3 : i32
    %c0_i32_11 = arith.constant 0 : i32
    %21 = tpu.memref_slice %arg6[%c3_i32_10, %c0_i32_11] : memref<8x64xf32, #tpu.memory_space<vmem>> -> memref<1x64xf32, #tpu.memory_space<vmem>>
    %22 = tpu.memref_slice %arg7[%c3_i32] : memref<8x!tpu.dma_semaphore, #tpu.memory_space<semaphore_mem>> -> memref<1x!tpu.dma_semaphore, #tpu.memory_space<semaphore_mem>>
    %23 = tpu.memref_squeeze %22 : memref<1x!tpu.dma_semaphore, #tpu.memory_space<semaphore_mem>> -> memref<!tpu.dma_semaphore, #tpu.memory_space<semaphore_mem>>
    tpu.enqueue_dma source(%20 : memref<1x64xf32, #tpu.memory_space<any>>) target(%21 : memref<1x64xf32, #tpu.memory_space<vmem>>) target_semaphore(%23 : memref<!tpu.dma_semaphore, #tpu.memory_space<semaphore_mem>>)
    %24 = arith.index_cast %arg0 : i32 to index
    %c4 = arith.constant 4 : index
    %25 = memref.load %arg1[%24, %c4] : memref<2x8xi32, #tpu.memory_space<smem>>
    %c4_i32 = arith.constant 4 : i32
    %c0_i32_12 = arith.constant 0 : i32
    %26 = tpu.memref_slice %arg2[%25, %c0_i32_12] : memref<16384x64xf32, #tpu.memory_space<any>> -> memref<1x64xf32, #tpu.memory_space<any>>
    %c4_i32_13 = arith.constant 4 : i32
    %c0_i32_14 = arith.constant 0 : i32
    %27 = tpu.memref_slice %arg6[%c4_i32_13, %c0_i32_14] : memref<8x64xf32, #tpu.memory_space<vmem>> -> memref<1x64xf32, #tpu.memory_space<vmem>>
    %28 = tpu.memref_slice %arg7[%c4_i32] : memref<8x!tpu.dma_semaphore, #tpu.memory_space<semaphore_mem>> -> memref<1x!tpu.dma_semaphore, #tpu.memory_space<semaphore_mem>>
    %29 = tpu.memref_squeeze %28 : memref<1x!tpu.dma_semaphore, #tpu.memory_space<semaphore_mem>> -> memref<!tpu.dma_semaphore, #tpu.memory_space<semaphore_mem>>
    tpu.enqueue_dma source(%26 : memref<1x64xf32, #tpu.memory_space<any>>) target(%27 : memref<1x64xf32, #tpu.memory_space<vmem>>) target_semaphore(%29 : memref<!tpu.dma_semaphore, #tpu.memory_space<semaphore_mem>>)
    %30 = arith.index_cast %arg0 : i32 to index
    %c5 = arith.constant 5 : index
    %31 = memref.load %arg1[%30, %c5] : memref<2x8xi32, #tpu.memory_space<smem>>
    %c5_i32 = arith.constant 5 : i32
    %c0_i32_15 = arith.constant 0 : i32
    %32 = tpu.memref_slice %arg2[%31, %c0_i32_15] : memref<16384x64xf32, #tpu.memory_space<any>> -> memref<1x64xf32, #tpu.memory_space<any>>
    %c5_i32_16 = arith.constant 5 : i32
    %c0_i32_17 = arith.constant 0 : i32
    %33 = tpu.memref_slice %arg6[%c5_i32_16, %c0_i32_17] : memref<8x64xf32, #tpu.memory_space<vmem>> -> memref<1x64xf32, #tpu.memory_space<vmem>>
    %34 = tpu.memref_slice %arg7[%c5_i32] : memref<8x!tpu.dma_semaphore, #tpu.memory_space<semaphore_mem>> -> memref<1x!tpu.dma_semaphore, #tpu.memory_space<semaphore_mem>>
    %35 = tpu.memref_squeeze %34 : memref<1x!tpu.dma_semaphore, #tpu.memory_space<semaphore_mem>> -> memref<!tpu.dma_semaphore, #tpu.memory_space<semaphore_mem>>
    tpu.enqueue_dma source(%32 : memref<1x64xf32, #tpu.memory_space<any>>) target(%33 : memref<1x64xf32, #tpu.memory_space<vmem>>) target_semaphore(%35 : memref<!tpu.dma_semaphore, #tpu.memory_space<semaphore_mem>>)
    %36 = arith.index_cast %arg0 : i32 to index
    %c6 = arith.constant 6 : index
    %37 = memref.load %arg1[%36, %c6] : memref<2x8xi32, #tpu.memory_space<smem>>
    %c6_i32 = arith.constant 6 : i32
    %c0_i32_18 = arith.constant 0 : i32
    %38 = tpu.memref_slice %arg2[%37, %c0_i32_18] : memref<16384x64xf32, #tpu.memory_space<any>> -> memref<1x64xf32, #tpu.memory_space<any>>
    %c6_i32_19 = arith.constant 6 : i32
    %c0_i32_20 = arith.constant 0 : i32
    %39 = tpu.memref_slice %arg6[%c6_i32_19, %c0_i32_20] : memref<8x64xf32, #tpu.memory_space<vmem>> -> memref<1x64xf32, #tpu.memory_space<vmem>>
    %40 = tpu.memref_slice %arg7[%c6_i32] : memref<8x!tpu.dma_semaphore, #tpu.memory_space<semaphore_mem>> -> memref<1x!tpu.dma_semaphore, #tpu.memory_space<semaphore_mem>>
    %41 = tpu.memref_squeeze %40 : memref<1x!tpu.dma_semaphore, #tpu.memory_space<semaphore_mem>> -> memref<!tpu.dma_semaphore, #tpu.memory_space<semaphore_mem>>
    tpu.enqueue_dma source(%38 : memref<1x64xf32, #tpu.memory_space<any>>) target(%39 : memref<1x64xf32, #tpu.memory_space<vmem>>) target_semaphore(%41 : memref<!tpu.dma_semaphore, #tpu.memory_space<semaphore_mem>>)
    %42 = arith.index_cast %arg0 : i32 to index
    %c7 = arith.constant 7 : index
    %43 = memref.load %arg1[%42, %c7] : memref<2x8xi32, #tpu.memory_space<smem>>
    %c7_i32 = arith.constant 7 : i32
    %c0_i32_21 = arith.constant 0 : i32
    %44 = tpu.memref_slice %arg2[%43, %c0_i32_21] : memref<16384x64xf32, #tpu.memory_space<any>> -> memref<1x64xf32, #tpu.memory_space<any>>
    %c7_i32_22 = arith.constant 7 : i32
    %c0_i32_23 = arith.constant 0 : i32
    %45 = tpu.memref_slice %arg6[%c7_i32_22, %c0_i32_23] : memref<8x64xf32, #tpu.memory_space<vmem>> -> memref<1x64xf32, #tpu.memory_space<vmem>>
    %46 = tpu.memref_slice %arg7[%c7_i32] : memref<8x!tpu.dma_semaphore, #tpu.memory_space<semaphore_mem>> -> memref<1x!tpu.dma_semaphore, #tpu.memory_space<semaphore_mem>>
    %47 = tpu.memref_squeeze %46 : memref<1x!tpu.dma_semaphore, #tpu.memory_space<semaphore_mem>> -> memref<!tpu.dma_semaphore, #tpu.memory_space<semaphore_mem>>
    tpu.enqueue_dma source(%44 : memref<1x64xf32, #tpu.memory_space<any>>) target(%45 : memref<1x64xf32, #tpu.memory_space<vmem>>) target_semaphore(%47 : memref<!tpu.dma_semaphore, #tpu.memory_space<semaphore_mem>>)
    %c0_i32_24 = arith.constant 0 : i32
    %c0_i32_25 = arith.constant 0 : i32
    %48 = tpu.memref_slice %arg2[%1, %c0_i32_25] : memref<16384x64xf32, #tpu.memory_space<any>> -> memref<1x64xf32, #tpu.memory_space<any>>
    %c0_i32_26 = arith.constant 0 : i32
    %c0_i32_27 = arith.constant 0 : i32
    %49 = tpu.memref_slice %arg6[%c0_i32_26, %c0_i32_27] : memref<8x64xf32, #tpu.memory_space<vmem>> -> memref<1x64xf32, #tpu.memory_space<vmem>>
    %50 = tpu.memref_slice %arg7[%c0_i32_24] : memref<8x!tpu.dma_semaphore, #tpu.memory_space<semaphore_mem>> -> memref<1x!tpu.dma_semaphore, #tpu.memory_space<semaphore_mem>>
    %51 = tpu.memref_squeeze %50 : memref<1x!tpu.dma_semaphore, #tpu.memory_space<semaphore_mem>> -> memref<!tpu.dma_semaphore, #tpu.memory_space<semaphore_mem>>
    tpu.wait_dma2 semaphore(%51 : memref<!tpu.dma_semaphore, #tpu.memory_space<semaphore_mem>>) src(%48 : memref<1x64xf32, #tpu.memory_space<any>>) dst(%49 : memref<1x64xf32, #tpu.memory_space<vmem>>)
    %c1_i32_28 = arith.constant 1 : i32
    %c0_i32_29 = arith.constant 0 : i32
    %52 = tpu.memref_slice %arg2[%7, %c0_i32_29] : memref<16384x64xf32, #tpu.memory_space<any>> -> memref<1x64xf32, #tpu.memory_space<any>>
    %c1_i32_30 = arith.constant 1 : i32
    %c0_i32_31 = arith.constant 0 : i32
    %53 = tpu.memref_slice %arg6[%c1_i32_30, %c0_i32_31] : memref<8x64xf32, #tpu.memory_space<vmem>> -> memref<1x64xf32, #tpu.memory_space<vmem>>
    %54 = tpu.memref_slice %arg7[%c1_i32_28] : memref<8x!tpu.dma_semaphore, #tpu.memory_space<semaphore_mem>> -> memref<1x!tpu.dma_semaphore, #tpu.memory_space<semaphore_mem>>
    %55 = tpu.memref_squeeze %54 : memref<1x!tpu.dma_semaphore, #tpu.memory_space<semaphore_mem>> -> memref<!tpu.dma_semaphore, #tpu.memory_space<semaphore_mem>>
    tpu.wait_dma2 semaphore(%55 : memref<!tpu.dma_semaphore, #tpu.memory_space<semaphore_mem>>) src(%52 : memref<1x64xf32, #tpu.memory_space<any>>) dst(%53 : memref<1x64xf32, #tpu.memory_space<vmem>>)
    %c2_i32_32 = arith.constant 2 : i32
    %c0_i32_33 = arith.constant 0 : i32
    %56 = tpu.memref_slice %arg2[%13, %c0_i32_33] : memref<16384x64xf32, #tpu.memory_space<any>> -> memref<1x64xf32, #tpu.memory_space<any>>
    %c2_i32_34 = arith.constant 2 : i32
    %c0_i32_35 = arith.constant 0 : i32
    %57 = tpu.memref_slice %arg6[%c2_i32_34, %c0_i32_35] : memref<8x64xf32, #tpu.memory_space<vmem>> -> memref<1x64xf32, #tpu.memory_space<vmem>>
    %58 = tpu.memref_slice %arg7[%c2_i32_32] : memref<8x!tpu.dma_semaphore, #tpu.memory_space<semaphore_mem>> -> memref<1x!tpu.dma_semaphore, #tpu.memory_space<semaphore_mem>>
    %59 = tpu.memref_squeeze %58 : memref<1x!tpu.dma_semaphore, #tpu.memory_space<semaphore_mem>> -> memref<!tpu.dma_semaphore, #tpu.memory_space<semaphore_mem>>
    tpu.wait_dma2 semaphore(%59 : memref<!tpu.dma_semaphore, #tpu.memory_space<semaphore_mem>>) src(%56 : memref<1x64xf32, #tpu.memory_space<any>>) dst(%57 : memref<1x64xf32, #tpu.memory_space<vmem>>)
    %c3_i32_36 = arith.constant 3 : i32
    %c0_i32_37 = arith.constant 0 : i32
    %60 = tpu.memref_slice %arg2[%19, %c0_i32_37] : memref<16384x64xf32, #tpu.memory_space<any>> -> memref<1x64xf32, #tpu.memory_space<any>>
    %c3_i32_38 = arith.constant 3 : i32
    %c0_i32_39 = arith.constant 0 : i32
    %61 = tpu.memref_slice %arg6[%c3_i32_38, %c0_i32_39] : memref<8x64xf32, #tpu.memory_space<vmem>> -> memref<1x64xf32, #tpu.memory_space<vmem>>
    %62 = tpu.memref_slice %arg7[%c3_i32_36] : memref<8x!tpu.dma_semaphore, #tpu.memory_space<semaphore_mem>> -> memref<1x!tpu.dma_semaphore, #tpu.memory_space<semaphore_mem>>
    %63 = tpu.memref_squeeze %62 : memref<1x!tpu.dma_semaphore, #tpu.memory_space<semaphore_mem>> -> memref<!tpu.dma_semaphore, #tpu.memory_space<semaphore_mem>>
    tpu.wait_dma2 semaphore(%63 : memref<!tpu.dma_semaphore, #tpu.memory_space<semaphore_mem>>) src(%60 : memref<1x64xf32, #tpu.memory_space<any>>) dst(%61 : memref<1x64xf32, #tpu.memory_space<vmem>>)
    %c4_i32_40 = arith.constant 4 : i32
    %c0_i32_41 = arith.constant 0 : i32
    %64 = tpu.memref_slice %arg2[%25, %c0_i32_41] : memref<16384x64xf32, #tpu.memory_space<any>> -> memref<1x64xf32, #tpu.memory_space<any>>
    %c4_i32_42 = arith.constant 4 : i32
    %c0_i32_43 = arith.constant 0 : i32
    %65 = tpu.memref_slice %arg6[%c4_i32_42, %c0_i32_43] : memref<8x64xf32, #tpu.memory_space<vmem>> -> memref<1x64xf32, #tpu.memory_space<vmem>>
    %66 = tpu.memref_slice %arg7[%c4_i32_40] : memref<8x!tpu.dma_semaphore, #tpu.memory_space<semaphore_mem>> -> memref<1x!tpu.dma_semaphore, #tpu.memory_space<semaphore_mem>>
    %67 = tpu.memref_squeeze %66 : memref<1x!tpu.dma_semaphore, #tpu.memory_space<semaphore_mem>> -> memref<!tpu.dma_semaphore, #tpu.memory_space<semaphore_mem>>
    tpu.wait_dma2 semaphore(%67 : memref<!tpu.dma_semaphore, #tpu.memory_space<semaphore_mem>>) src(%64 : memref<1x64xf32, #tpu.memory_space<any>>) dst(%65 : memref<1x64xf32, #tpu.memory_space<vmem>>)
    %c5_i32_44 = arith.constant 5 : i32
    %c0_i32_45 = arith.constant 0 : i32
    %68 = tpu.memref_slice %arg2[%31, %c0_i32_45] : memref<16384x64xf32, #tpu.memory_space<any>> -> memref<1x64xf32, #tpu.memory_space<any>>
    %c5_i32_46 = arith.constant 5 : i32
    %c0_i32_47 = arith.constant 0 : i32
    %69 = tpu.memref_slice %arg6[%c5_i32_46, %c0_i32_47] : memref<8x64xf32, #tpu.memory_space<vmem>> -> memref<1x64xf32, #tpu.memory_space<vmem>>
    %70 = tpu.memref_slice %arg7[%c5_i32_44] : memref<8x!tpu.dma_semaphore, #tpu.memory_space<semaphore_mem>> -> memref<1x!tpu.dma_semaphore, #tpu.memory_space<semaphore_mem>>
    %71 = tpu.memref_squeeze %70 : memref<1x!tpu.dma_semaphore, #tpu.memory_space<semaphore_mem>> -> memref<!tpu.dma_semaphore, #tpu.memory_space<semaphore_mem>>
    tpu.wait_dma2 semaphore(%71 : memref<!tpu.dma_semaphore, #tpu.memory_space<semaphore_mem>>) src(%68 : memref<1x64xf32, #tpu.memory_space<any>>) dst(%69 : memref<1x64xf32, #tpu.memory_space<vmem>>)
    %c6_i32_48 = arith.constant 6 : i32
    %c0_i32_49 = arith.constant 0 : i32
    %72 = tpu.memref_slice %arg2[%37, %c0_i32_49] : memref<16384x64xf32, #tpu.memory_space<any>> -> memref<1x64xf32, #tpu.memory_space<any>>
    %c6_i32_50 = arith.constant 6 : i32
    %c0_i32_51 = arith.constant 0 : i32
    %73 = tpu.memref_slice %arg6[%c6_i32_50, %c0_i32_51] : memref<8x64xf32, #tpu.memory_space<vmem>> -> memref<1x64xf32, #tpu.memory_space<vmem>>
    %74 = tpu.memref_slice %arg7[%c6_i32_48] : memref<8x!tpu.dma_semaphore, #tpu.memory_space<semaphore_mem>> -> memref<1x!tpu.dma_semaphore, #tpu.memory_space<semaphore_mem>>
    %75 = tpu.memref_squeeze %74 : memref<1x!tpu.dma_semaphore, #tpu.memory_space<semaphore_mem>> -> memref<!tpu.dma_semaphore, #tpu.memory_space<semaphore_mem>>
    tpu.wait_dma2 semaphore(%75 : memref<!tpu.dma_semaphore, #tpu.memory_space<semaphore_mem>>) src(%72 : memref<1x64xf32, #tpu.memory_space<any>>) dst(%73 : memref<1x64xf32, #tpu.memory_space<vmem>>)
    %c7_i32_52 = arith.constant 7 : i32
    %c0_i32_53 = arith.constant 0 : i32
    %76 = tpu.memref_slice %arg2[%43, %c0_i32_53] : memref<16384x64xf32, #tpu.memory_space<any>> -> memref<1x64xf32, #tpu.memory_space<any>>
    %c7_i32_54 = arith.constant 7 : i32
    %c0_i32_55 = arith.constant 0 : i32
    %77 = tpu.memref_slice %arg6[%c7_i32_54, %c0_i32_55] : memref<8x64xf32, #tpu.memory_space<vmem>> -> memref<1x64xf32, #tpu.memory_space<vmem>>
    %78 = tpu.memref_slice %arg7[%c7_i32_52] : memref<8x!tpu.dma_semaphore, #tpu.memory_space<semaphore_mem>> -> memref<1x!tpu.dma_semaphore, #tpu.memory_space<semaphore_mem>>
    %79 = tpu.memref_squeeze %78 : memref<1x!tpu.dma_semaphore, #tpu.memory_space<semaphore_mem>> -> memref<!tpu.dma_semaphore, #tpu.memory_space<semaphore_mem>>
    tpu.wait_dma2 semaphore(%79 : memref<!tpu.dma_semaphore, #tpu.memory_space<semaphore_mem>>) src(%76 : memref<1x64xf32, #tpu.memory_space<any>>) dst(%77 : memref<1x64xf32, #tpu.memory_space<vmem>>)
    %c0_56 = arith.constant 0 : index
    %c0_57 = arith.constant 0 : index
    %80 = vector.load %arg6[%c0_56, %c0_57] : memref<8x64xf32, #tpu.memory_space<vmem>>, vector<8x64xf32>
    %c5_58 = arith.constant 5 : index
    %c0_59 = arith.constant 0 : index
    %81 = vector.load %arg3[%c5_58, %c0_59] : memref<48x64xf32, #tpu.memory_space<vmem>>, vector<8x64xf32>
    %82 = arith.addf %80, %81 : vector<8x64xf32>
    %c0_60 = arith.constant 0 : index
    %83 = memref.load %arg4[%c0_60] : memref<2xf32, #tpu.memory_space<smem>>
    %c1_61 = arith.constant 1 : index
    %84 = memref.load %arg4[%c1_61] : memref<2xf32, #tpu.memory_space<smem>>
    %85 = vector.broadcast %83 : f32 to vector<8x64xf32>
    %86 = arith.subf %82, %85 : vector<8x64xf32>
    %87 = arith.subf %84, %83 : f32
    %88 = vector.broadcast %87 : f32 to vector<8x64xf32>
    %89 = arith.divf %86, %88 : vector<8x64xf32>
    %cst = arith.constant 5.000000e-01 : f32
    %90 = vector.broadcast %cst : f32 to vector<8x64xf32>
    %91 = arith.subf %89, %90 : vector<8x64xf32>
    %cst_62 = arith.constant 2.000000e+00 : f32
    %92 = vector.broadcast %cst_62 : f32 to vector<8x64xf32>
    %93 = arith.mulf %91, %92 : vector<8x64xf32>
    %cst_63 = arith.constant 1.280000e+02 : f32
    %94 = vector.broadcast %cst_63 : f32 to vector<8x64xf32>
    %95 = arith.mulf %93, %94 : vector<8x64xf32>
    %cst_64 = arith.constant 5.000000e-01 : f32
    %96 = vector.broadcast %cst_64 : f32 to vector<8x64xf32>
    %97 = arith.addf %95, %96 : vector<8x64xf32>
    %98 = math.floor %97 : vector<8x64xf32>
    %cst_65 = arith.constant -1.280000e+02 : f32
    %cst_66 = arith.constant 1.270000e+02 : f32
    %99 = vector.broadcast %cst_65 : f32 to vector<8x64xf32>
    %100 = arith.maximumf %99, %98 : vector<8x64xf32>
    %101 = vector.broadcast %cst_66 : f32 to vector<8x64xf32>
    %102 = arith.minimumf %101, %100 : vector<8x64xf32>
    %103 = vector.shape_cast %102 : vector<8x64xf32> to vector<1x8x64xf32>
    %c0_67 = arith.constant 0 : index
    %c0_68 = arith.constant 0 : index
    %c0_69 = arith.constant 0 : index
    %104 = vector.load %arg5[%c0_67, %c0_68, %c0_69] : memref<1x8x64xf32, #tpu.memory_space<vmem>>, vector<1x8x64xf32>
    tpu.vector_store %arg5[%c0_67, %c0_68, %c0_69], %103 {strides = array<i32>} : memref<1x8x64xf32, #tpu.memory_space<vmem>>, vector<1x8x64xf32>,
    return
  }
  func.func @transform_1(%arg0: i32, %arg1: memref<2x8xi32, #tpu.memory_space<smem>>) -> (i32, i32) {
    %c0_i32 = arith.constant 0 : i32
    %c0_i32_0 = arith.constant 0 : i32
    %c0_i32_1 = arith.constant 0 : i32
    return %c0_i32, %c0_i32_0 : i32, i32
  }
  func.func @transform_2(%arg0: i32, %arg1: memref<2x8xi32, #tpu.memory_space<smem>>) -> i32 {
    %c0_i32 = arith.constant 0 : i32
    %c0_i32_0 = arith.constant 0 : i32
    return %c0_i32 : i32
  }
  func.func @transform_3(%arg0: i32, %arg1: memref<2x8xi32, #tpu.memory_space<smem>>) -> (i32, i32, i32) {
    %c0_i32 = arith.constant 0 : i32
    %c0_i32_0 = arith.constant 0 : i32
    %c0_i32_1 = arith.constant 0 : i32
    return %arg0, %c0_i32, %c0_i32_0 : i32, i32, i32
  }
}

</mosaic_0001>

<bundles_post_ra>
// kernel: lpre_forward.1
= control target key start
LH: loop header
LB: loop body
LE: loop exit
PB: predicated region body
PF: predicated region fallthrough
CT: control target
= control target key end

     0   :  { %s863_s18 = smov [#allocation5]   ;;  %s1026_s0 = inlined_call_operand.vmem [shape: s32[2,8], index: 0, kind: input, shape index: {}]   ;;  %s1027_s1 = inlined_call_operand.vmem [shape: f32[16384,64], index: 1, kind: input, shape index: {}]   ;;  %s1028_s2 = inlined_call_operand.vmem [shape: f32[48,64], index: 2, kind: input, shape index: {}]   ;;  %s1029_s3 = inlined_call_operand.vmem [shape: f32[2], index: 3, kind: input, shape index: {}]   ;;  %s1030_s4 = inlined_call_operand.hbm [shape: f32[2,8,64], index: 4, kind: output, shape index: {}]  }
   0x1   :  { %s10_s17 = sshll.u32 %s1026_s0, 4  ;;  %s11_s17 = int_to_ptr.vmem [resolvable:$true] %s10_s17 }
   0x2   :  { %13 = dma.vmem_to_smem %s11_s17, 32, %s863_s18, [#allocation4] }
   0x3   :  { %821 = dma.done.wait [#allocation4], 32 }
   0x4   :  { %822 = vsyncadd [#allocation4], 4294967264 }
   0x5   :  { %16 = sfence }
   0x6   :  { %17 = vsyncpa [#allocation8], 0 }
   0x7   :  { %18 = vsyncpa [#allocation7], 0 }
   0x8   :  { %20 = vsyncpa [#allocation7 + $0x1], 0  ;;  %s893_s19 = smov 0   ;;  %s895_s20 = smov 0  }
   0x9   :  { %s897_s21 = smov 0   ;;  %s899_s22 = smov 0  }
   0xa LB: > { %s914_s0 = sadd.s32 4294967295, %s861_s22   ;;  %s676_s23 = sadd.s32 4294967294, %s861_s22   ;;  %s861_s22 = sphi %s899_s22, %s1036_s22   ;;  %s857_s21 = sphi %s897_s21, %s1035_s21   ;;  %s853_s20 = sphi %s895_s20, %s1034_s20   ;;  %s849_s19 = sphi %s893_s19, %s1033_s19  }
   0xb   : > { %s918_s24 = sadd.s32 1, %s861_s22   ;;  %s75_s25 = sadd.s32 1, %s857_s21 }
   0xc   : > { %s72_s26 = ssub.s32 %s861_s22, %s918_s24  ;;  %p85_p0 = scmp.ne.s32.totalorder %s857_s21, %s853_s20 }
   0xd   : > { %p73_p1 = scmp.eq.s32.totalorder %s72_s26, 0  ;;  %p86_p2 = scmp.eq.s32.totalorder %s914_s0, 1 }
   0xe   : > { %p91_p3 = scmp.ne.s32.totalorder %s853_s20, %s849_s19  ;;  %p92_p4 = scmp.eq.s32.totalorder %s676_s23, 1 }
   0xf   : > { %s929_s27 = scalar_select %p73_p1, %s857_s21, %s75_s25  }
  0x10   : > { %p931_p5 = por %p86_p2, %p85_p0  ;;  %p935_p6 = por %p92_p4, %p91_p3 }
  0x11   : > { %p677_p7 = scmp.ge.s32.totalorder %s861_s22, 1  ;;  %p99_p8 = scmp.lt.s32.totalorder %s861_s22, 3 }
  0x12   : > { %p711_p9 = scmp.eq.s32.totalorder %s914_s0, 0  ;;  %s114_s6 = sshll.u32 %s1029_s3, 4  ;;  %s115_s6 = int_to_ptr.vmem [resolvable:$true] %s114_s6 }
  0x13   : > { %p100_p10 = pnand %p677_p7, %p99_p8  ;;  %s864_s7 = smov [#allocation6]  }
  0x15   : > { %p703_p11 = pneg %p100_p10  ;;  %127 = sbr.rel (%p100_p10) target bundleno = 171 (0xab), region = 28 }
  0x17   : > { %p704_p12 = pnand %p711_p9, %p703_p11 }
  0x19   : > { %706 = dma.vmem_to_smem (!%p704_p12), %s115_s6, 16, %s864_s7, [#allocation8]  }
  0x1a   : > { %824 = dma.done.wait (%p711_p9), [#allocation8], 16  }
  0x1b   : > { %826 = vsyncadd (%p711_p9), [#allocation8], 4294967280 }
  0x1c   : > { %134 = sfence }
  0x1d   : > { %s143_s8 = sand.u32 1, %s853_s20   ;;  %s947_s9 = sshll.u32 %s914_s0, 7 }
  0x1e   : > { %s951_s10 = sshll.u32 %s143_s8, 3  ;;  %s147_s11 = sld [smem:[#allocation5 + %s947_s9]] }
  0x1f   : > { %s145_s15 = scalar_lea.vmem [#allocation9], %s951_s10 }
  0x24   : > { %s148_s14 = scalar_lea.vmem %s1027_s1, %s147_s11 }
  0x25   : > { %v163_v0 = vld [vmem:[%s148_s14] sm:$0x1] }
  0x26   : > { %164 = vst [vmem:[#allocation2] sm:$0x1] %v163_v0 }
  0x27   : > { %182 = vsyncadd [#allocation3], 16  ;;  %s183_s16 = sadd.s32 1, %s947_s9 }
  0x28   : > { %s184_s17 = sld [smem:[#allocation5 + %s183_s16]] }
  0x2e   : > { %s185_s25 = scalar_lea.vmem %s1027_s1, %s184_s17 }
  0x2f   : > { %v202_v1 = vld [vmem:[%s185_s25] sm:$0x1] }
  0x30   : > { %203 = vst [vmem:[#allocation2 + $0x1] sm:$0x1] %v202_v1 }
  0x31   : > { %221 = vsyncadd [#allocation3 + $0x1], 16  ;;  %s222_s26 = sadd.s32 2, %s947_s9 }
  0x32   : > { %s223_s30 = sld [smem:[#allocation5 + %s222_s26]] }
  0x38   : > { %s224_s7 = scalar_lea.vmem %s1027_s1, %s223_s30 }
  0x39   : > { %v241_v2 = vld [vmem:[%s224_s7] sm:$0x1] }
  0x3a   : > { %242 = vst [vmem:[#allocation2 + $0x2] sm:$0x1] %v241_v2 }
  0x3b   : > { %260 = vsyncadd [#allocation3 + $0x2], 16  ;;  %s261_s11 = sadd.s32 3, %s947_s9 }
  0x3c   : > { %s262_s12 = sld [smem:[#allocation5 + %s261_s11]] }
  0x42   : > { %s263_s16 = scalar_lea.vmem %s1027_s1, %s262_s12 }
  0x43   : > { %v280_v3 = vld [vmem:[%s263_s16] sm:$0x1] }
  0x44   : > { %281 = vst [vmem:[#allocation2 + $0x3] sm:$0x1] %v280_v3 }
  0x45   : > { %299 = vsyncadd [#allocation3 + $0x3], 16  ;;  %s300_s17 = sadd.s32 4, %s947_s9 }
  0x46   : > { %s301_s18 = sld [smem:[#allocation5 + %s300_s17]] }
  0x4c   : > { %s302_s26 = scalar_lea.vmem %s1027_s1, %s301_s18 }
  0x4d   : > { %v319_v4 = vld [vmem:[%s302_s26] sm:$0x1] }
  0x4e   : > { %320 = vst [vmem:[#allocation2 + $0x4] sm:$0x1] %v319_v4 }
  0x4f   : > { %338 = vsyncadd [#allocation3 + $0x4], 16  ;;  %s339_s30 = sadd.s32 5, %s947_s9 }
  0x50   : > { %s340_s5 = sld [smem:[#allocation5 + %s339_s30]] }
  0x56   : > { %s341_s11 = scalar_lea.vmem %s1027_s1, %s340_s5 }
  0x57   : > { %v358_v5 = vld [vmem:[%s341_s11] sm:$0x1] }
  0x58   : > { %359 = vst [vmem:[#allocation2 + $0x5] sm:$0x1] %v358_v5 }
  0x59   : > { %377 = vsyncadd [#allocation3 + $0x5], 16  ;;  %s378_s12 = sadd.s32 6, %s947_s9 }
  0x5a   : > { %s379_s13 = sld [smem:[#allocation5 + %s378_s12]] }
  0x60   : > { %s380_s17 = scalar_lea.vmem %s1027_s1, %s379_s13 }
  0x61   : > { %v397_v6 = vld [vmem:[%s380_s17] sm:$0x1] }
  0x62   : > { %398 = vst [vmem:[#allocation2 + $0x6] sm:$0x1] %v397_v6 }
  0x63   : > { %416 = vsyncadd [#allocation3 + $0x6], 16  ;;  %s417_s18 = sadd.s32 7, %s947_s9 }
  0x64   : > { %s418_s23 = sld [smem:[#allocation5 + %s417_s18]] }
  0x6a   : > { %s419_s30 = scalar_lea.vmem %s1027_s1, %s418_s23 }
  0x6b   : > { %v436_v7 = vld [vmem:[%s419_s30] sm:$0x1] }
  0x6c   : > { %437 = vst [vmem:[#allocation2 + $0x7] sm:$0x1] %v436_v7 }
  0x6d   : > { %455 = vsyncadd [#allocation3 + $0x7], 16 }
  0x6e   : > { %827 = dma.done.wait [#allocation3], 16 }
  0x6f   : > { %828 = vsyncadd [#allocation3], 4294967280 }
  0x70   : > { %829 = dma.done.wait [#allocation3 + $0x1], 16 }
  0x71   : > { %830 = vsyncadd [#allocation3 + $0x1], 4294967280 }
  0x72   : > { %831 = dma.done.wait [#allocation3 + $0x2], 16 }
  0x73   : > { %832 = vsyncadd [#allocation3 + $0x2], 4294967280 }
  0x74   : > { %833 = dma.done.wait [#allocation3 + $0x3], 16 }
  0x75   : > { %834 = vsyncadd [#allocation3 + $0x3], 4294967280 }
  0x76   : > { %835 = dma.done.wait [#allocation3 + $0x4], 16 }
  0x77   : > { %836 = vsyncadd [#allocation3 + $0x4], 4294967280 }
  0x78   : > { %837 = dma.done.wait [#allocation3 + $0x5], 16 }
  0x79   : > { %838 = vsyncadd [#allocation3 + $0x5], 4294967280 }
  0x7a   : > { %839 = dma.done.wait [#allocation3 + $0x6], 16 }
  0x7b   : > { %840 = vsyncadd [#allocation3 + $0x6], 4294967280 }
  0x7c   : > { %841 = dma.done.wait [#allocation3 + $0x7], 16 }
  0x7d   : > { %842 = vsyncadd [#allocation3 + $0x7], 4294967280  ;;  %s476_s9 = sld [smem:[#allocation6]]  ;;  %v473_v9 = vld [vmem:[#allocation2] sm:$0xff]  ;;  %s686_s12 = sshll.u32 %s914_s0, 3  ;;  %vm504_vm4 = vcmask 523264  }
  0x7e   : > { %s683_s5 = sld [smem:[#allocation6 + $0x1]]  ;;  %v474_v10 = vld [vmem:[%s1028_s2 + $0x5] sm:$0xff]  ;;  %s517_s16 = scalar_lea.hbm %s1030_s4, %s686_s12 }
  0x7f   : > { %v475_v13 = vadd.f32 %v474_v10, %v473_v9  ;;  %s519_s17 = sshll.u32 %s145_s15, 4  ;;  %s521_s18 = sshll.u32 %s517_s16, 4  ;;  %s520_s17 = int_to_ptr.vmem [resolvable:$true] %s519_s17  ;;  %s522_s18 = int_to_ptr.hbm [resolvable:$true] %s521_s18 }
  0x80   : > { %s507_s0 = scalar_lea.sflag [#allocation7], %s143_s8  ;;  %s791_s23 = sshra.s32 %s522_s18, 4  ;;  %s792_s23 = int_to_ptr.hbm [resolvable:$true] %s791_s23 }
  0x81   : > { %s793_s25 = scalar_lea.hbm %s792_s23, 8  ;;  %p798_p2 = scmp.lt.s32.totalorder %s792_s23, %s1030_s4 }
  0x82   : > { %p794_p13 = scmp.ne.s32.totalorder %s792_s23, %s793_s25 }
  0x83   : > { %v478_v17 = vstv %s476_s9 }
  0x84   : > { %s480_s6 = ssub.f32 %s683_s5, %s476_s9  ;;  %v479_v20 = vsub.f32 %v475_v13, %v478_v17  ;;  %p795_p0 = pnand %p794_p13, %p931_p5 }
  0x85   : > { %s797_s9 = scalar_lea.hbm %s1030_s4, 16 }
  0x86   : > { %v481_v8 = vstv %s480_s6  ;;  %p796_p1 = pneg %p795_p0  ;;  %p799_p3 = scmp.lt.s32.totalorder %s797_s9, %s793_s25 }
  0x87   : > { %748 = vrcp.f32 %v481_v8  ;;  %v493_v14 = vand.u32 2147483648, %v481_v8  ;;  %vm487_vm0 = vweird.f32 %v481_v8  ;;  %v491_v16 = vand.u32 2147483647, %v481_v8 }
  0x88   : > { %p800_p4 = por %p799_p3, %p798_p2 }
  0x89   : > { %v494_v19 = vor.u32 1.1754944e-38, %v493_v14  ;;  %vm492_vm3 = vcmp.eq.f32.partialorder %v491_v16, 8.507059e+37 }
  0x8a   : > { %p801_p7 = pnand %p800_p4, %p796_p1 }
  0x8d   : > { %v749_v11 = vpop.eup %748 }
  0x8e   : > { %v483_v12 = vmul.f32 %v749_v11, %v481_v8  ;;  %vm488_vm1 = vweird.f32 %v749_v11 }
  0x8f   : > { %vm489_vm2 = vmor %vm487_vm0, %vm488_vm1 }
  0x90   : > { %v484_v15 = vsub.f32 1.0, %v483_v12 }
  0x92   : > { %v485_v18 = vmul.f32 %v749_v11, %v484_v15 }
  0x94   : > { %v486_v21 = vadd.f32 %v749_v11, %v485_v18 }
  0x96   : > { %v490_v22 = vsel %vm489_vm2, %v749_v11, %v486_v21 }
  0x97   : > { %v495_v23 = vsel %vm492_vm3, %v494_v19, %v490_v22 }
  0x98   : > { %v496_v24 = vmul.f32 %v495_v23, %v479_v20 }
  0x9a   : > { %v684_v25 = vadd.f32 -0.5, %v496_v24 }
  0x9c   : > { %v498_v26 = vmul.f32 2.0, %v684_v25 }
  0x9e   : > { %v499_v27 = vmul.f32 128.0, %v498_v26 }
  0xa0   : > { %v500_v28 = vadd.f32 0.5, %v499_v27 }
  0xa2   : > { %v501_v29 = vfloor.f32 %v500_v28 }
  0xa4   : > { %v502_v30 = vmax.f32 %v501_v29, -128.0 }
  0xa6   : > { %v503_v31 = vmin.f32 %v502_v30, 127.0 }
  0xa8   : > { %505 = vst.msk [vmem:[%s145_s15] sm:$0xff] %vm504_vm4, %v503_v31 }
  0xa9   : > { %804 = shalt.err (!%p801_p7)
}
  0xaa   : > { %701 = dma.vmem_to_hbm [thread:$0]  (%p931_p5), %s520_s17, 128, %s522_s18, %s507_s0  }
  0xab PF: > { %p713_p8 = scmp.ge.s32.totalorder %s861_s22, 2  ;;  %s533_s8 = sand.u32 1, %s849_s19  }
  0xac   : > { %s534_s10 = scalar_lea.sflag [#allocation7], %s533_s8 }
  0xad   : > { %p708_p9 = pnand %p713_p8, %p935_p6 }
  0xaf   : > { %p709_p10 = pneg %p708_p9 }
  0xb1   : > { %844 = dma.done.wait (%p709_p10), %s534_s10, 128  }
  0xb2   : > { %846 = vsyncadd (%p709_p10), %s534_s10, 4294967168  ;;  %p23_p11 = scmp.ge.s32.totalorder %s918_s24, 4   ;;  %s1033_s19 = smov %s853_s20 }
  0xb3   : > { %s1034_s20 = smov %s857_s21  ;;  %s1035_s21 = smov %s929_s27 }
  0xb4   : > { %s1036_s22 = smov %s918_s24  ;;  %25 = sbr.rel (!%p23_p11) target bundleno = 10 (0xa), region = 366 }
  0xb9   :  { %540 = vsyncpa [#allocation7], 1 }
  0xba   :  { %542 = vsyncpa [#allocation7 + $0x1], 1 }
  0xbb   :  { %543 = vsyncpa [#allocation8], 1 }
  0xbc   :  { %545 = vsyncpa [#allocation8 + $0x1], 1 }
  0xbd   :  { %546 = vsyncmov [#allocation3] }
  0xc0   :  { %s547_s22 = vpop.sfrf %546 }
  0xc1   :  { %p689_p5 = scmp.ne.s32.totalorder %s547_s22, 0 }
  0xc3   :  { %551 = shalt.err (%p689_p5)  }
  0xc4   :  { %553 = vsyncmov [#allocation3 + $0x1] }
  0xc7   :  { %s554_s28 = vpop.sfrf %553 }
  0xc8   :  { %p690_p6 = scmp.ne.s32.totalorder %s554_s28, 0 }
  0xca   :  { %558 = shalt.err (%p690_p6)  }
  0xcb   :  { %560 = vsyncmov [#allocation3 + $0x2] }
  0xce   :  { %s561_s29 = vpop.sfrf %560 }
  0xcf   :  { %p691_p12 = scmp.ne.s32.totalorder %s561_s29, 0 }
  0xd1   :  { %565 = shalt.err (%p691_p12)  }
  0xd2   :  { %567 = vsyncmov [#allocation3 + $0x3] }
  0xd5   :  { %s568_s27 = vpop.sfrf %567 }
  0xd6   :  { %p692_p13 = scmp.ne.s32.totalorder %s568_s27, 0 }
  0xd8   :  { %572 = shalt.err (%p692_p13)  }
  0xd9   :  { %574 = vsyncmov [#allocation3 + $0x4] }
  0xdc   :  { %s575_s1 = vpop.sfrf %574 }
  0xdd   :  { %p693_p0 = scmp.ne.s32.totalorder %s575_s1, 0 }
  0xdf   :  { %579 = shalt.err (%p693_p0)  }
  0xe0   :  { %581 = vsyncmov [#allocation3 + $0x5] }
  0xe3   :  { %s582_s2 = vpop.sfrf %581 }
  0xe4   :  { %p694_p1 = scmp.ne.s32.totalorder %s582_s2, 0 }
  0xe6   :  { %586 = shalt.err (%p694_p1)  }
  0xe7   :  { %588 = vsyncmov [#allocation3 + $0x6] }
  0xea   :  { %s589_s3 = vpop.sfrf %588 }
  0xeb   :  { %p695_p2 = scmp.ne.s32.totalorder %s589_s3, 0 }
  0xed   :  { %593 = shalt.err (%p695_p2)  }
  0xee   :  { %595 = vsyncmov [#allocation3 + $0x7] }
  0xf1   :  { %s596_s4 = vpop.sfrf %595 }
  0xf2   :  { %p696_p3 = scmp.ne.s32.totalorder %s596_s4, 0 }
  0xf4   :  { %600 = shalt.err (%p696_p3)  }

</bundles_post_ra>
